<compile_context>
chip_gen: v7x
topology: tpu7x:2x2x1
jax: 0.10.0
libtpu: 0.0.40
codegen_flags: <defaults>
</compile_context>

<pallas_src>
import jax
import jax.numpy as jnp
from jax.experimental import pallas as pl
from jax.experimental.pallas import tpu as pltpu

HIDDEN = 128
IN_DIM = 3
OUT_DIM = 1
IN_PAD = 8        # input features padded to one sublane group
TM_MAX = 512      # batch-tile (lane) width


def _round_up(a, b):
    return (a + b - 1) // b * b


def _mlp_kernel(xT_ref, w1T_ref, b1_ref, w2T_ref, b2_ref, w3T_ref, b3_ref,
                w4_ref, b4_ref, o_ref):
    # Layer 1: (128, 8) @ (8, TM) on the MXU; bias column broadcasts over lanes.
    h = jnp.tanh(
        jnp.dot(w1T_ref[...], xT_ref[...], preferred_element_type=jnp.float32)
        + b1_ref[...])
    # Dropout(p=0.02): identity in eval/forward semantics.
    # Layer 2: (128, 128) @ (128, TM)
    h = jnp.tanh(
        jnp.dot(w2T_ref[...], h, preferred_element_type=jnp.float32)
        + b2_ref[...])
    # Dropout: identity.
    # Layer 3: (128, 128) @ (128, TM)
    h = jnp.tanh(
        jnp.dot(w3T_ref[...], h, preferred_element_type=jnp.float32)
        + b3_ref[...])
    # Layer 4 (output dim 1): VPU multiply + sublane reduction -> (1, TM).
    # Avoids a 99%-zero 128x128 matmul and a 128x-padded writeback.
    o_ref[...] = (jnp.sum(h * w4_ref[...], axis=0, keepdims=True)
                  + b4_ref[...])


@jax.jit
def pinn_forward(x, params):
    """x: [N, 3] float32 -> [N, 1] float32."""
    (w1, b1, w2, b2, w3, b3, w4, b4) = params
    N = x.shape[0]

    tm = min(TM_MAX, _round_up(N, 128))   # lane-width of one batch tile
    n_pad = _round_up(N, tm)
    grid = (n_pad // tm,)

    # Transposed, feature-padded input: (8, n_pad); rows >= IN_DIM are zero.
    xT = jnp.zeros((IN_PAD, n_pad), jnp.float32).at[:IN_DIM, :N].set(x.T)
    # Weights in "W^T @ x^T" form; biases as (128, 1) columns.
    w1T = jnp.zeros((HIDDEN, IN_PAD), jnp.float32).at[:, :IN_DIM].set(w1.T)
    w2T = w2.T
    w3T = w3.T
    w4c = w4.reshape(HIDDEN, OUT_DIM)     # (128, 1)
    b1c = b1.reshape(HIDDEN, 1)
    b2c = b2.reshape(HIDDEN, 1)
    b3c = b3.reshape(HIDDEN, 1)
    b4c = b4.reshape(1, 1)

    const = lambda r, c: pl.BlockSpec((r, c), lambda i: (0, 0))

    out = pl.pallas_call(
        _mlp_kernel,
        out_shape=jax.ShapeDtypeStruct((1, n_pad), jnp.float32),
        grid_spec=pltpu.PrefetchScalarGridSpec(
            num_scalar_prefetch=0,
            grid=grid,
            in_specs=[
                pl.BlockSpec((IN_PAD, tm), lambda i: (0, i)),   # x^T tile
                const(HIDDEN, IN_PAD),                          # w1^T (padded)
                const(HIDDEN, 1),                               # b1
                const(HIDDEN, HIDDEN),                          # w2^T
                const(HIDDEN, 1),                               # b2
                const(HIDDEN, HIDDEN),                          # w3^T
                const(HIDDEN, 1),                               # b3
                const(HIDDEN, OUT_DIM),                         # w4 (128, 1)
                const(1, 1),                                    # b4
            ],
            out_specs=pl.BlockSpec((1, tm), lambda i: (0, i)),
        ),
        compiler_params=pltpu.CompilerParams(
            dimension_semantics=("parallel",)),
    )(xT, w1T, b1c, w2T, b2c, w3T, b3c, w4c, b4c)

    return out[0, :N].reshape(N, OUT_DIM)


def init_params(key):
    """Deterministic init mimicking PyTorch nn.Linear default U[-1/sqrt(fan_in), +]."""
    dims = [(IN_DIM, HIDDEN), (HIDDEN, HIDDEN), (HIDDEN, HIDDEN), (HIDDEN, OUT_DIM)]
    params = []
    for (fan_in, fan_out) in dims:
        key, kw, kb = jax.random.split(key, 3)
        bound = 1.0 / jnp.sqrt(jnp.float32(fan_in))
        w = jax.random.uniform(kw, (fan_in, fan_out), jnp.float32, -bound, bound)
        b = jax.random.uniform(kb, (fan_out,), jnp.float32, -bound, bound)
        params.extend([w, b])
    return tuple(params)


def _reference(x, params):
    (w1, b1, w2, b2, w3, b3, w4, b4) = params
    h = jnp.tanh(x @ w1 + b1)
    h = jnp.tanh(h @ w2 + b2)
    h = jnp.tanh(h @ w3 + b3)
    return h @ w4 + b4


if __name__ == "__main__":
    key = jax.random.PRNGKey(0)
    key, kx = jax.random.split(key)
    N = 16                                  # small demo batch
    x = jax.random.normal(kx, (N, IN_DIM), jnp.float32)

    # Physics scalar parameters (param1..param9, epi_thickness, T_initial)
    # exist only for the PDE loss and do not participate in forward().
    params = init_params(key)

    out = pinn_forward(x, params)
    out = jax.block_until_ready(out)

    ref = _reference(x, params)
    assert out.shape == (N, OUT_DIM)
    err = float(jnp.max(jnp.abs(out - ref)))
    assert err < 2e-3, f"max abs err {err}"

    print("KERNEL_OK")
</pallas_src>

<mosaic_0001>
module attributes {stable_mosaic.version = 11 : i64} {
  func.func @_mlp_kernel(%arg0: i32, %arg1: memref<8x128xf32, #tpu.memory_space<vmem>>, %arg2: memref<128x8xf32, #tpu.memory_space<vmem>>, %arg3: memref<128x1xf32, #tpu.memory_space<vmem>>, %arg4: memref<128x128xf32, #tpu.memory_space<vmem>>, %arg5: memref<128x1xf32, #tpu.memory_space<vmem>>, %arg6: memref<128x128xf32, #tpu.memory_space<vmem>>, %arg7: memref<128x1xf32, #tpu.memory_space<vmem>>, %arg8: memref<128x1xf32, #tpu.memory_space<vmem>>, %arg9: memref<1x1xf32, #tpu.memory_space<vmem>>, %arg10: memref<1x128xf32, #tpu.memory_space<vmem>>) attributes {dimension_semantics = [#tpu.dimension_semantics<parallel>], iteration_bounds = array<i64: 1>, scalar_prefetch = 0 : i64, scratch_operands = 0 : i64, tpu.core_type = #tpu.core_type<tc>, window_params = [{transform_indices = @transform_0, window_bounds = array<i64: 8, 128>}, {pipeline_mode = #tpu.pipeline_mode<synchronous>, transform_indices = @transform_1, window_bounds = array<i64: 128, 8>}, {pipeline_mode = #tpu.pipeline_mode<synchronous>, transform_indices = @transform_2, window_bounds = array<i64: 128, 1>}, {pipeline_mode = #tpu.pipeline_mode<synchronous>, transform_indices = @transform_3, window_bounds = array<i64: 128, 128>}, {pipeline_mode = #tpu.pipeline_mode<synchronous>, transform_indices = @transform_4, window_bounds = array<i64: 128, 1>}, {pipeline_mode = #tpu.pipeline_mode<synchronous>, transform_indices = @transform_5, window_bounds = array<i64: 128, 128>}, {pipeline_mode = #tpu.pipeline_mode<synchronous>, transform_indices = @transform_6, window_bounds = array<i64: 128, 1>}, {pipeline_mode = #tpu.pipeline_mode<synchronous>, transform_indices = @transform_7, window_bounds = array<i64: 128, 1>}, {pipeline_mode = #tpu.pipeline_mode<synchronous>, transform_indices = @transform_8, window_bounds = array<i64: 1, 1>}, {transform_indices = @transform_9, window_bounds = array<i64: 1, 128>}]} {
    %c0 = arith.constant 0 : index
    %c0_0 = arith.constant 0 : index
    %0 = vector.load %arg2[%c0, %c0_0] : memref<128x8xf32, #tpu.memory_space<vmem>>, vector<128x8xf32>
    %c0_1 = arith.constant 0 : index
    %c0_2 = arith.constant 0 : index
    %1 = vector.load %arg1[%c0_1, %c0_2] : memref<8x128xf32, #tpu.memory_space<vmem>>, vector<8x128xf32>
    %cst = arith.constant dense<0.000000e+00> : vector<128x128xf32>
    %2 = tpu.matmul %0, %1, %cst {dimension_numbers = #tpu.dot_dimension_numbers<[1], [0], [0], [1], [0, 0, 1, 1], [], []>} : vector<128x8xf32>, vector<8x128xf32>, vector<128x128xf32> -> vector<128x128xf32>
    %c0_3 = arith.constant 0 : index
    %c0_4 = arith.constant 0 : index
    %3 = vector.load %arg3[%c0_3, %c0_4] : memref<128x1xf32, #tpu.memory_space<vmem>>, vector<128x1xf32>
    %4 = vector.broadcast %3 : vector<128x1xf32> to vector<128x128xf32>
    %5 = arith.addf %2, %4 : vector<128x128xf32>
    %6 = math.tanh %5 : vector<128x128xf32>
    %c0_5 = arith.constant 0 : index
    %c0_6 = arith.constant 0 : index
    %7 = vector.load %arg4[%c0_5, %c0_6] : memref<128x128xf32, #tpu.memory_space<vmem>>, vector<128x128xf32>
    %cst_7 = arith.constant dense<0.000000e+00> : vector<128x128xf32>
    %8 = tpu.matmul %7, %6, %cst_7 {dimension_numbers = #tpu.dot_dimension_numbers<[1], [0], [0], [1], [0, 0, 1, 1], [], []>} : vector<128x128xf32>, vector<128x128xf32>, vector<128x128xf32> -> vector<128x128xf32>
    %c0_8 = arith.constant 0 : index
    %c0_9 = arith.constant 0 : index
    %9 = vector.load %arg5[%c0_8, %c0_9] : memref<128x1xf32, #tpu.memory_space<vmem>>, vector<128x1xf32>
    %10 = vector.broadcast %9 : vector<128x1xf32> to vector<128x128xf32>
    %11 = arith.addf %8, %10 : vector<128x128xf32>
    %12 = math.tanh %11 : vector<128x128xf32>
    %c0_10 = arith.constant 0 : index
    %c0_11 = arith.constant 0 : index
    %13 = vector.load %arg6[%c0_10, %c0_11] : memref<128x128xf32, #tpu.memory_space<vmem>>, vector<128x128xf32>
    %cst_12 = arith.constant dense<0.000000e+00> : vector<128x128xf32>
    %14 = tpu.matmul %13, %12, %cst_12 {dimension_numbers = #tpu.dot_dimension_numbers<[1], [0], [0], [1], [0, 0, 1, 1], [], []>} : vector<128x128xf32>, vector<128x128xf32>, vector<128x128xf32> -> vector<128x128xf32>
    %c0_13 = arith.constant 0 : index
    %c0_14 = arith.constant 0 : index
    %15 = vector.load %arg7[%c0_13, %c0_14] : memref<128x1xf32, #tpu.memory_space<vmem>>, vector<128x1xf32>
    %16 = vector.broadcast %15 : vector<128x1xf32> to vector<128x128xf32>
    %17 = arith.addf %14, %16 : vector<128x128xf32>
    %18 = math.tanh %17 : vector<128x128xf32>
    %c0_15 = arith.constant 0 : index
    %c0_16 = arith.constant 0 : index
    %19 = vector.load %arg8[%c0_15, %c0_16] : memref<128x1xf32, #tpu.memory_space<vmem>>, vector<128x1xf32>
    %20 = vector.broadcast %19 : vector<128x1xf32> to vector<128x128xf32>
    %21 = arith.mulf %18, %20 : vector<128x128xf32>
    %cst_17 = arith.constant dense<0.000000e+00> : vector<128xf32>
    %22 = vector.multi_reduction <add>, %21, %cst_17 [0] : vector<128x128xf32> to vector<128xf32>
    %23 = vector.shape_cast %22 : vector<128xf32> to vector<1x128xf32>
    %c0_18 = arith.constant 0 : index
    %c0_19 = arith.constant 0 : index
    %24 = vector.load %arg9[%c0_18, %c0_19] : memref<1x1xf32, #tpu.memory_space<vmem>>, vector<1x1xf32>
    %25 = vector.broadcast %24 : vector<1x1xf32> to vector<1x128xf32>
    %26 = arith.addf %23, %25 : vector<1x128xf32>
    %c0_20 = arith.constant 0 : index
    %c0_21 = arith.constant 0 : index
    %27 = vector.load %arg10[%c0_20, %c0_21] : memref<1x128xf32, #tpu.memory_space<vmem>>, vector<1x128xf32>
    tpu.vector_store %arg10[%c0_20, %c0_21], %26 {strides = array<i32>} : memref<1x128xf32, #tpu.memory_space<vmem>>, vector<1x128xf32>,
    return
  }
  func.func @transform_0(%arg0: i32) -> (i32, i32) {
    %c0_i32 = arith.constant 0 : i32
    %c0_i32_0 = arith.constant 0 : i32
    return %c0_i32, %arg0 : i32, i32
  }
  func.func @transform_1(%arg0: i32) -> (i32, i32) {
    %c0_i32 = arith.constant 0 : i32
    %c0_i32_0 = arith.constant 0 : i32
    %c0_i32_1 = arith.constant 0 : i32
    return %c0_i32, %c0_i32_0 : i32, i32
  }
  func.func @transform_2(%arg0: i32) -> (i32, i32) {
    %c0_i32 = arith.constant 0 : i32
    %c0_i32_0 = arith.constant 0 : i32
    %c0_i32_1 = arith.constant 0 : i32
    return %c0_i32, %c0_i32_0 : i32, i32
  }
  func.func @transform_3(%arg0: i32) -> (i32, i32) {
    %c0_i32 = arith.constant 0 : i32
    %c0_i32_0 = arith.constant 0 : i32
    %c0_i32_1 = arith.constant 0 : i32
    return %c0_i32, %c0_i32_0 : i32, i32
  }
  func.func @transform_4(%arg0: i32) -> (i32, i32) {
    %c0_i32 = arith.constant 0 : i32
    %c0_i32_0 = arith.constant 0 : i32
    %c0_i32_1 = arith.constant 0 : i32
    return %c0_i32, %c0_i32_0 : i32, i32
  }
  func.func @transform_5(%arg0: i32) -> (i32, i32) {
    %c0_i32 = arith.constant 0 : i32
    %c0_i32_0 = arith.constant 0 : i32
    %c0_i32_1 = arith.constant 0 : i32
    return %c0_i32, %c0_i32_0 : i32, i32
  }
  func.func @transform_6(%arg0: i32) -> (i32, i32) {
    %c0_i32 = arith.constant 0 : i32
    %c0_i32_0 = arith.constant 0 : i32
    %c0_i32_1 = arith.constant 0 : i32
    return %c0_i32, %c0_i32_0 : i32, i32
  }
  func.func @transform_7(%arg0: i32) -> (i32, i32) {
    %c0_i32 = arith.constant 0 : i32
    %c0_i32_0 = arith.constant 0 : i32
    %c0_i32_1 = arith.constant 0 : i32
    return %c0_i32, %c0_i32_0 : i32, i32
  }
  func.func @transform_8(%arg0: i32) -> (i32, i32) {
    %c0_i32 = arith.constant 0 : i32
    %c0_i32_0 = arith.constant 0 : i32
    %c0_i32_1 = arith.constant 0 : i32
    return %c0_i32, %c0_i32_0 : i32, i32
  }
  func.func @transform_9(%arg0: i32) -> (i32, i32) {
    %c0_i32 = arith.constant 0 : i32
    %c0_i32_0 = arith.constant 0 : i32
    return %c0_i32, %arg0 : i32, i32
  }
}

</mosaic_0001>

<bundles_post_ra>
// kernel: pinn_forward.1
= control target key start
LH: loop header
LB: loop body
LE: loop exit
PB: predicated region body
PF: predicated region fallthrough
CT: control target
= control target key end

     0   :  { %vm147_vm0 = vcmask 64512   ;;  %v1450_v0 = vmov 0   ;;  %s1862_s2 = inlined_call_operand.vmem [shape: f32[128,1], index: 2, kind: input, shape index: {}]   ;;  %s1863_s0 = inlined_call_operand.vmem [shape: f32[8,128], index: 0, kind: input, shape index: {}]   ;;  %s1864_s1 = inlined_call_operand.vmem [shape: f32[128,8], index: 1, kind: input, shape index: {}]   ;;  %s1865_s8 = inlined_call_operand.<no memory space> [shape: f32[1,1], index: 8, kind: input, shape index: {}]   ;;  %s1866_s4 = inlined_call_operand.vmem [shape: f32[128,1], index: 4, kind: input, shape index: {}]   ;;  %s1867_s6 = inlined_call_operand.vmem [shape: f32[128,1], index: 6, kind: input, shape index: {}]   ;;  %s1868_s7 = inlined_call_operand.vmem [shape: f32[128,1], index: 7, kind: input, shape index: {}]   ;;  %s1869_s3 = inlined_call_operand.vmem [shape: f32[128,128], index: 3, kind: input, shape index: {}]   ;;  %s1870_s5 = inlined_call_operand.vmem [shape: f32[128,128], index: 5, kind: input, shape index: {}]   ;;  %s1871_s9 = inlined_call_operand.vmem [shape: f32[1,128], index: 9, kind: output, shape index: {}]  }
   0x1   :  { %1353 = vset.pattern.permute.xlu1 %v1450_v0  ;;  %1352 = vset.pattern.permute.xlu0 %v1450_v0  ;;  %v53_v1 = vld [vmem:[%s1862_s2 + $0x10] sm:$0xff]  ;;  %v51_v2 = vld [vmem:[%s1862_s2] sm:$0xff]  ;;  %v14_v4 = vstv %s1865_s8  ;;  %v35_v6 = vld [vmem:[%s1864_s1 + $0x8] sm:$0xff] }
   0x2   :  { %v50_v3 = vld [vmem:[%s1863_s0] sm:$0xff]  ;;  %79 = vperm.xlu1 %1353, %v53_v1   ;;  %69 = vperm.xlu0 %1352, %v51_v2   ;;  %15 = vst [vmem:[#allocation2] sm:$0x1] %v14_v4  ;;  %v54_v7 = vld [vmem:[%s1862_s2 + $0x18] sm:$0xff]  ;;  %v52_v8 = vld [vmem:[%s1862_s2 + $0x8] sm:$0xff] }
   0x3   :  { %v34_v5 = vld [vmem:[%s1864_s1] sm:$0xff]  ;;  %1149 = vmatprep.subr.mxu0 %v50_v3  ;;  %v36_v9 = vld [vmem:[%s1864_s1 + $0x10] sm:$0xff]  ;;  %v37_v10 = vld [vmem:[%s1864_s1 + $0x18] sm:$0xff] }
   0x4   :  { %1151 = vmatprep.mubr.msk.f32.mxu0 %vm147_vm0, %v34_v5  ;;  %1150 = vmatpush3.msra.mxu0 %v50_v3  ;;  %v56_v11 = vld [vmem:[%s1862_s2 + $0x28] sm:$0xff]  ;;  %v55_v12 = vld [vmem:[%s1862_s2 + $0x20] sm:$0xff]  ;;  %v58_v15 = vld [vmem:[%s1862_s2 + $0x38] sm:$0xff] }
   0x5   :  { %1152 = vmatmul.mubr.msk.f32.vlgmr.msra.gmra.mrb[0].mxu0 %vm147_vm0, %v35_v6  ;;  %v38_v13 = vld [vmem:[%s1864_s1 + $0x20] sm:$0xff]  ;;  %v39_v14 = vld [vmem:[%s1864_s1 + $0x28] sm:$0xff]  ;;  %v57_v16 = vld [vmem:[%s1862_s2 + $0x30] sm:$0xff] }
   0x6   :  { %84 = vperm.xlu1 %1353, %v54_v7   ;;  %74 = vperm.xlu0 %1352, %v52_v8   ;;  %v40_v17 = vld [vmem:[%s1864_s1 + $0x30] sm:$0xff]  ;;  %v41_v18 = vld [vmem:[%s1864_s1 + $0x38] sm:$0xff]  ;;  %v60_v19 = vld [vmem:[%s1862_s2 + $0x48] sm:$0xff] }
   0x7   :  { %1154 = vmatprep.mubr.msk.f32.mxu0 %vm147_vm0, %v36_v9  ;;  %v59_v20 = vld [vmem:[%s1862_s2 + $0x40] sm:$0xff]  ;;  %v43_v22 = vld [vmem:[%s1864_s1 + $0x48] sm:$0xff]  ;;  %v62_v23 = vld [vmem:[%s1862_s2 + $0x58] sm:$0xff] }
   0x8   :  { %v42_v21 = vld [vmem:[%s1864_s1 + $0x40] sm:$0xff]  ;;  %v61_v24 = vld [vmem:[%s1862_s2 + $0x50] sm:$0xff]  ;;  %v45_v26 = vld [vmem:[%s1864_s1 + $0x58] sm:$0xff] }
   0x9   :  { %1155 = vmatmul.mubr.msk.f32.gmra.mrb[2].mxu0 %vm147_vm0, %v37_v10  ;;  %v44_v25 = vld [vmem:[%s1864_s1 + $0x50] sm:$0xff]  ;;  %v64_v27 = vld [vmem:[%s1862_s2 + $0x68] sm:$0xff]  ;;  %v63_v28 = vld [vmem:[%s1862_s2 + $0x60] sm:$0xff] }
   0xa   :  { %94 = vperm.xlu1 %1353, %v56_v11   ;;  %89 = vperm.xlu0 %1352, %v55_v12   ;;  %v46_v29 = vld [vmem:[%s1864_s1 + $0x60] sm:$0xff]  ;;  %v47_v30 = vld [vmem:[%s1864_s1 + $0x68] sm:$0xff]  ;;  %v66_v31 = vld [vmem:[%s1862_s2 + $0x78] sm:$0xff] }
   0xb   :  { %1157 = vmatprep.mubr.msk.f32.mxu0 %vm147_vm0, %v38_v13  ;;  %v65_v32 = vld [vmem:[%s1862_s2 + $0x70] sm:$0xff]  ;;  %v49_v34 = vld [vmem:[%s1864_s1 + $0x78] sm:$0xff]  ;;  %v374_v35 = vld [vmem:[%s1866_s4 + $0x8] sm:$0xff] }
   0xc   :  { %v48_v33 = vld [vmem:[%s1864_s1 + $0x70] sm:$0xff]  ;;  %v373_v36 = vld [vmem:[%s1866_s4] sm:$0xff]  ;;  %v376_v37 = vld [vmem:[%s1866_s4 + $0x18] sm:$0xff] }
   0xd   :  { %1158 = vmatmul.mubr.msk.f32.gmra.mrb[4].mxu0 %vm147_vm0, %v39_v14  ;;  %v375_v38 = vld [vmem:[%s1866_s4 + $0x10] sm:$0xff]  ;;  %v378_v39 = vld [vmem:[%s1866_s4 + $0x28] sm:$0xff]  ;;  %v377_v40 = vld [vmem:[%s1866_s4 + $0x20] sm:$0xff] }
   0xe   :  { %104 = vperm.xlu1 %1353, %v58_v15   ;;  %99 = vperm.xlu0 %1352, %v57_v16   ;;  %v380_v41 = vld [vmem:[%s1866_s4 + $0x38] sm:$0xff]  ;;  %v379_v42 = vld [vmem:[%s1866_s4 + $0x30] sm:$0xff]  ;;  %v382_v43 = vld [vmem:[%s1866_s4 + $0x48] sm:$0xff] }
   0xf   :  { %1160 = vmatprep.mubr.msk.f32.mxu0 %vm147_vm0, %v40_v17  ;;  %v381_v44 = vld [vmem:[%s1866_s4 + $0x40] sm:$0xff]  ;;  %v384_v45 = vld [vmem:[%s1866_s4 + $0x58] sm:$0xff]  ;;  %v383_v46 = vld [vmem:[%s1866_s4 + $0x50] sm:$0xff] }
  0x10   :  { %v386_v47 = vld [vmem:[%s1866_s4 + $0x68] sm:$0xff]  ;;  %v385_v48 = vld [vmem:[%s1866_s4 + $0x60] sm:$0xff]  ;;  %v388_v49 = vld [vmem:[%s1866_s4 + $0x78] sm:$0xff] }
  0x11   :  { %1161 = vmatmul.mubr.msk.f32.gmra.mrb[6].mxu0 %vm147_vm0, %v41_v18  ;;  %v387_v50 = vld [vmem:[%s1866_s4 + $0x70] sm:$0xff]  ;;  %v647_v51 = vld [vmem:[%s1867_s6 + $0x8] sm:$0xff]  ;;  %v646_v52 = vld [vmem:[%s1867_s6] sm:$0xff] }
  0x12   :  { %114 = vperm.xlu1 %1353, %v60_v19   ;;  %109 = vperm.xlu0 %1352, %v59_v20   ;;  %v649_v53 = vld [vmem:[%s1867_s6 + $0x18] sm:$0xff]  ;;  %v648_v54 = vld [vmem:[%s1867_s6 + $0x10] sm:$0xff]  ;;  %v651_v55 = vld [vmem:[%s1867_s6 + $0x28] sm:$0xff] }
  0x13   :  { %1163 = vmatprep.mubr.msk.f32.mxu0 %vm147_vm0, %v42_v21  ;;  %v650_v56 = vld [vmem:[%s1867_s6 + $0x20] sm:$0xff]  ;;  %v653_v57 = vld [vmem:[%s1867_s6 + $0x38] sm:$0xff]  ;;  %v652_v58 = vld [vmem:[%s1867_s6 + $0x30] sm:$0xff] }
  0x14   :  { %v904_v59 = vld [vmem:[%s1868_s7 + $0x8] sm:$0xff]  ;;  %v903_v60 = vld [vmem:[%s1868_s7] sm:$0xff]  ;;  %v905_v61 = vld [vmem:[%s1868_s7 + $0x10] sm:$0xff] }
  0x15   :  { %1164 = vmatmul.mubr.msk.f32.gmra.mrb[8].mxu0 %vm147_vm0, %v43_v22  ;;  %v654_v62 = vld [vmem:[%s1867_s6 + $0x40] sm:$0xff]  ;;  %v906_v63 = vld [vmem:[%s1868_s7 + $0x18] sm:$0xff]  ;;  %v655_v0 = vld [vmem:[%s1867_s6 + $0x48] sm:$0xff] }
  0x16   :  { %124 = vperm.xlu1 %1353, %v62_v23   ;;  %119 = vperm.xlu0 %1352, %v61_v24   ;;  %v907_v1 = vld [vmem:[%s1868_s7 + $0x20] sm:$0xff]  ;;  %v656_v2 = vld [vmem:[%s1867_s6 + $0x50] sm:$0xff]  ;;  %v908_v3 = vld [vmem:[%s1868_s7 + $0x28] sm:$0xff] }
  0x17   :  { %1166 = vmatprep.mubr.msk.f32.mxu0 %vm147_vm0, %v44_v25  ;;  %v657_v4 = vld [vmem:[%s1867_s6 + $0x58] sm:$0xff]  ;;  %v909_v5 = vld [vmem:[%s1868_s7 + $0x30] sm:$0xff]  ;;  %v658_v6 = vld [vmem:[%s1867_s6 + $0x60] sm:$0xff] }
  0x18   :  { %v910_v7 = vld [vmem:[%s1868_s7 + $0x38] sm:$0xff]  ;;  %v659_v8 = vld [vmem:[%s1867_s6 + $0x68] sm:$0xff]  ;;  %v911_v9 = vld [vmem:[%s1868_s7 + $0x40] sm:$0xff] }
  0x19   :  { %1167 = vmatmul.mubr.msk.f32.gmra.mrb[10].mxu0 %vm147_vm0, %v45_v26  ;;  %v660_v10 = vld [vmem:[%s1867_s6 + $0x70] sm:$0xff]  ;;  %v912_v11 = vld [vmem:[%s1868_s7 + $0x48] sm:$0xff]  ;;  %v661_v12 = vld [vmem:[%s1867_s6 + $0x78] sm:$0xff] }
  0x1a   :  { %134 = vperm.xlu1 %1353, %v64_v27   ;;  %129 = vperm.xlu0 %1352, %v63_v28   ;;  %v914_v13 = vld [vmem:[%s1868_s7 + $0x58] sm:$0xff]  ;;  %v913_v14 = vld [vmem:[%s1868_s7 + $0x50] sm:$0xff]  ;;  %v916_v15 = vld [vmem:[%s1868_s7 + $0x68] sm:$0xff] }
  0x1b   :  { %1169 = vmatprep.mubr.msk.f32.mxu0 %vm147_vm0, %v46_v29  ;;  %v915_v16 = vld [vmem:[%s1868_s7 + $0x60] sm:$0xff]  ;;  %v918_v17 = vld [vmem:[%s1868_s7 + $0x78] sm:$0xff]  ;;  %v917_v18 = vld [vmem:[%s1868_s7 + $0x70] sm:$0xff] }
  0x1c   :  { %v1036_v19 = vld [vmem:[#allocation2] sm:$0x1] }
  0x1d   :  { %1170 = vmatmul.mubr.msk.f32.gmra.mrb[12].mxu0 %vm147_vm0, %v47_v30  ;;  %v357_v20 = vld [vmem:[%s1869_s3] sm:$0xff] }
  0x1e   :  { %144 = vperm.xlu1 %1353, %v66_v31   ;;  %139 = vperm.xlu0 %1352, %v65_v32  }
  0x1f   :  { %1172 = vmatprep.mubr.msk.f32.mxu0 %vm147_vm0, %v48_v33  ;;  %1207 = vmatprep.mubr.f32.mxu1 %v357_v20 }
  0x21   :  { %1173 = vmatmul.mubr.msk.f32.gmra.mrb[14].mxu0 %vm147_vm0, %v49_v34 }
  0x22   :  { %396 = vperm.xlu1 %1353, %v374_v35   ;;  %391 = vperm.xlu0 %1352, %v373_v36  }
  0x26   :  { %406 = vperm.xlu1 %1353, %v376_v37   ;;  %401 = vperm.xlu0 %1352, %v375_v38  }
  0x2a   :  { %416 = vperm.xlu1 %1353, %v378_v39   ;;  %411 = vperm.xlu0 %1352, %v377_v40  }
  0x2e   :  { %426 = vperm.xlu1 %1353, %v380_v41   ;;  %421 = vperm.xlu0 %1352, %v379_v42  }
  0x32   :  { %436 = vperm.xlu1 %1353, %v382_v43   ;;  %431 = vperm.xlu0 %1352, %v381_v44  }
  0x36   :  { %446 = vperm.xlu1 %1353, %v384_v45   ;;  %441 = vperm.xlu0 %1352, %v383_v46  }
  0x3a   :  { %456 = vperm.xlu1 %1353, %v386_v47   ;;  %451 = vperm.xlu0 %1352, %v385_v48  }
  0x3e   :  { %466 = vperm.xlu1 %1353, %v388_v49   ;;  %461 = vperm.xlu0 %1352, %v387_v50  }
  0x42   :  { %669 = vperm.xlu1 %1353, %v647_v51   ;;  %664 = vperm.xlu0 %1352, %v646_v52  }
  0x46   :  { %679 = vperm.xlu1 %1353, %v649_v53   ;;  %674 = vperm.xlu0 %1352, %v648_v54  }
  0x4a   :  { %689 = vperm.xlu1 %1353, %v651_v55   ;;  %684 = vperm.xlu0 %1352, %v650_v56  }
  0x4e   :  { %699 = vperm.xlu1 %1353, %v653_v57   ;;  %694 = vperm.xlu0 %1352, %v652_v58  }
  0x52   :  { %926 = vperm.xlu1 %1353, %v904_v59   ;;  %921 = vperm.xlu0 %1352, %v903_v60  }
  0x56   :  { %931 = vperm.xlu1 %1353, %v905_v61   ;;  %704 = vperm.xlu0 %1352, %v654_v62  }
  0x5a   :  { %936 = vperm.xlu1 %1353, %v906_v63   ;;  %709 = vperm.xlu0 %1352, %v655_v0  }
  0x5e   :  { %941 = vperm.xlu1 %1353, %v907_v1   ;;  %714 = vperm.xlu0 %1352, %v656_v2  }
  0x62   :  { %946 = vperm.xlu1 %1353, %v908_v3   ;;  %719 = vperm.xlu0 %1352, %v657_v4  }
  0x66   :  { %951 = vperm.xlu1 %1353, %v909_v5   ;;  %724 = vperm.xlu0 %1352, %v658_v6  }
  0x6a   :  { %956 = vperm.xlu1 %1353, %v910_v7   ;;  %729 = vperm.xlu0 %1352, %v659_v8  }
  0x6e   :  { %961 = vperm.xlu1 %1353, %v911_v9   ;;  %734 = vperm.xlu0 %1352, %v660_v10  }
  0x72   :  { %966 = vperm.xlu1 %1353, %v912_v11   ;;  %739 = vperm.xlu0 %1352, %v661_v12  }
  0x76   :  { %976 = vperm.xlu1 %1353, %v914_v13   ;;  %971 = vperm.xlu0 %1352, %v913_v14  }
  0x7a   :  { %986 = vperm.xlu1 %1353, %v916_v15   ;;  %981 = vperm.xlu0 %1352, %v915_v16  }
  0x7e   :  { %996 = vperm.xlu1 %1353, %v918_v17   ;;  %991 = vperm.xlu0 %1352, %v917_v18  }
  0x81   :  { %v80_v21 = vpop.permute.xlu1 %79  ;;  %v70_v22 = vpop.permute.xlu0 %69 }
  0x82   :  { %1039 = vperm.xlu0 %1352, %v1036_v19  }
  0x85   :  { %v85_v23 = vpop.permute.xlu1 %84  ;;  %v75_v24 = vpop.permute.xlu0 %74 }
  0x89   :  { %v95_v25 = vpop.permute.xlu1 %94  ;;  %v90_v26 = vpop.permute.xlu0 %89 }
  0x8d   :  { %v105_v31 = vpop.permute.xlu1 %104  ;;  %v100_v33 = vpop.permute.xlu0 %99 }
  0x91   :  { %v115_v40 = vpop.permute.xlu1 %114  ;;  %v110_v42 = vpop.permute.xlu0 %109 }
  0x95   :  { %v125_v50 = vpop.permute.xlu1 %124  ;;  %v120_v53 = vpop.permute.xlu0 %119 }
  0x99   :  { %v135_v0 = vpop.permute.xlu1 %134  ;;  %v130_v2 = vpop.permute.xlu0 %129 }
  0x9d   :  { %v145_v11 = vpop.permute.xlu1 %144  ;;  %v140_v14 = vpop.permute.xlu0 %139 }
  0xd8   :  { %v1153_v27 = vpop.f32.mrb[0].mxu0 }
  0xd9   :  { %v268_v28 = vadd.f32 %v1153_v27, %v75_v24  ;;  %v262_v29 = vpop.f32.mrb[1].mxu0 }
  0xda   :  { %v263_v30 = vadd.f32 %v262_v29, %v70_v22  ;;  %v358_v29 = vld [vmem:[%s1869_s3 + $0x8] sm:$0xff] }
  0xdb   :  { %1354 = vtanh.f32 %v268_v28 }
  0xdc   :  { %1356 = vtanh.f32 %v263_v30  ;;  %v1156_v32 = vpop.f32.mrb[2].mxu0  ;;  %v359_v30 = vld [vmem:[%s1869_s3 + $0x10] sm:$0xff] }
  0xdd   :  { %v278_v34 = vadd.f32 %v1156_v32, %v85_v23  ;;  %v272_v35 = vpop.f32.mrb[3].mxu0  ;;  %v361_v32 = vld [vmem:[%s1869_s3 + $0x20] sm:$0xff] }
  0xde   :  { %v273_v36 = vadd.f32 %v272_v35, %v80_v21  ;;  %v364_v35 = vld [vmem:[%s1869_s3 + $0x38] sm:$0xff] }
  0xdf   :  { %1358 = vtanh.f32 %v278_v34  ;;  %v363_v34 = vld [vmem:[%s1869_s3 + $0x30] sm:$0xff] }
  0xe0   :  { %1360 = vtanh.f32 %v273_v36  ;;  %v1159_v37 = vpop.f32.mrb[4].mxu0  ;;  %v365_v36 = vld [vmem:[%s1869_s3 + $0x40] sm:$0xff] }
  0xe1   :  { %v288_v38 = vadd.f32 %v1159_v37, %v95_v25  ;;  %v282_v39 = vpop.f32.mrb[5].mxu0  ;;  %v366_v37 = vld [vmem:[%s1869_s3 + $0x48] sm:$0xff] }
  0xe2   :  { %v283_v41 = vadd.f32 %v282_v39, %v90_v26  ;;  %v368_v39 = vld [vmem:[%s1869_s3 + $0x58] sm:$0xff] }
  0xe3   :  { %1362 = vtanh.f32 %v288_v38  ;;  %v367_v38 = vld [vmem:[%s1869_s3 + $0x50] sm:$0xff] }
  0xe4   :  { %1364 = vtanh.f32 %v283_v41  ;;  %v1162_v43 = vpop.f32.mrb[6].mxu0  ;;  %v370_v41 = vld [vmem:[%s1869_s3 + $0x68] sm:$0xff] }
  0xe5   :  { %v1355_v44 = vpop.eup %1354  ;;  %v298_v45 = vadd.f32 %v1162_v43, %v105_v31  ;;  %v292_v46 = vpop.f32.mrb[7].mxu0  ;;  %v360_v31 = vld [vmem:[%s1869_s3 + $0x18] sm:$0xff] }
  0xe6   :  { %v1357_v47 = vpop.eup %1356  ;;  %v293_v48 = vadd.f32 %v292_v46, %v100_v33  ;;  %v362_v33 = vld [vmem:[%s1869_s3 + $0x28] sm:$0xff]  ;;  %v372_v43 = vld [vmem:[%s1869_s3 + $0x78] sm:$0xff]  ;;  %v392_v46 = vpop.permute.xlu0 %391 }
  0xe7   :  { %1366 = vtanh.f32 %v298_v45  ;;  %v1287_v49 = vpack.c.bf16 %v1355_v44, %v1357_v47  ;;  %v630_v44 = vld [vmem:[%s1870_s5] sm:$0xff]  ;;  %v397_v45 = vpop.permute.xlu1 %396 }
  0xe8   :  { %1368 = vtanh.f32 %v293_v48  ;;  %v1165_v51 = vpop.f32.mrb[8].mxu0  ;;  %1263 = vmatprep.mubr.f32.mxu0 %v630_v44 }
  0xe9   :  { %v1359_v52 = vpop.eup %1358  ;;  %v308_v54 = vadd.f32 %v1165_v51, %v115_v40  ;;  %v302_v55 = vpop.f32.mrb[9].mxu0  ;;  %1288 = vmatprep.subr.bf16.mxu1 %v1287_v49  ;;  %v369_v40 = vld [vmem:[%s1869_s3 + $0x60] sm:$0xff] }
  0xea   :  { %v1361_v56 = vpop.eup %1360  ;;  %v303_v57 = vadd.f32 %v302_v55, %v110_v42  ;;  %1290 = vmatpush3.bf16.msra.mxu1 %v1287_v49  ;;  %v371_v42 = vld [vmem:[%s1869_s3 + $0x70] sm:$0xff]  ;;  %v402_v48 = vpop.permute.xlu0 %401 }
  0xeb   :  { %1370 = vtanh.f32 %v308_v54  ;;  %v1291_v58 = vpack.c.bf16 %v1359_v52, %v1361_v56  ;;  %v407_v47 = vpop.permute.xlu1 %406 }
  0xec   :  { %1372 = vtanh.f32 %v303_v57  ;;  %v1168_v59 = vpop.f32.mrb[10].mxu0 }
  0xed   :  { %v1363_v60 = vpop.eup %1362  ;;  %v318_v61 = vadd.f32 %v1168_v59, %v125_v50  ;;  %v312_v62 = vpop.f32.mrb[11].mxu0  ;;  %1292 = vmatprep.subr.bf16.mxu1 %v1291_v58 }
  0xee   :  { %v1365_v63 = vpop.eup %1364  ;;  %v313_v1 = vadd.f32 %v312_v62, %v120_v53  ;;  %1294 = vmatpush3.bf16.msra.mxu1 %v1291_v58  ;;  %v412_v50 = vpop.permute.xlu0 %411 }
  0xef   :  { %1374 = vtanh.f32 %v318_v61  ;;  %v1295_v3 = vpack.c.bf16 %v1363_v60, %v1365_v63  ;;  %v417_v49 = vpop.permute.xlu1 %416 }
  0xf0   :  { %1376 = vtanh.f32 %v313_v1  ;;  %v1171_v4 = vpop.f32.mrb[12].mxu0 }
  0xf1   :  { %v1367_v5 = vpop.eup %1366  ;;  %v328_v6 = vadd.f32 %v1171_v4, %v135_v0  ;;  %v322_v7 = vpop.f32.mrb[13].mxu0  ;;  %1296 = vmatprep.subr.bf16.mxu1 %v1295_v3 }
  0xf2   :  { %v1369_v8 = vpop.eup %1368  ;;  %v323_v9 = vadd.f32 %v322_v7, %v130_v2  ;;  %1298 = vmatpush3.bf16.msra.mxu1 %v1295_v3  ;;  %v422_v57 = vpop.permute.xlu0 %421 }
  0xf3   :  { %1378 = vtanh.f32 %v328_v6  ;;  %v1299_v10 = vpack.c.bf16 %v1367_v5, %v1369_v8  ;;  %v427_v55 = vpop.permute.xlu1 %426 }
  0xf4   :  { %1380 = vtanh.f32 %v323_v9  ;;  %v1174_v12 = vpop.f32.mrb[14].mxu0 }
  0xf5   :  { %v1371_v13 = vpop.eup %1370  ;;  %v338_v15 = vadd.f32 %v1174_v12, %v145_v11  ;;  %v332_v16 = vpop.f32.mrb[15].mxu0  ;;  %1300 = vmatprep.subr.bf16.mxu1 %v1299_v10 }
  0xf6   :  { %v1373_v17 = vpop.eup %1372  ;;  %v333_v18 = vadd.f32 %v332_v16, %v140_v14  ;;  %1302 = vmatpush3.bf16.msra.mxu1 %v1299_v10  ;;  %v432_v2 = vpop.permute.xlu0 %431 }
  0xf7   :  { %1382 = vtanh.f32 %v338_v15  ;;  %v1303_v19 = vpack.c.bf16 %v1371_v13, %v1373_v17  ;;  %v437_v0 = vpop.permute.xlu1 %436 }
  0xf8   :  { %1384 = vtanh.f32 %v333_v18 }
  0xf9   :  { %v1375_v20 = vpop.eup %1374  ;;  %1304 = vmatprep.subr.bf16.mxu1 %v1303_v19 }
  0xfa   :  { %v1377_v21 = vpop.eup %1376  ;;  %1306 = vmatpush3.bf16.msra.mxu1 %v1303_v19  ;;  %v442_v13 = vpop.permute.xlu0 %441 }
  0xfb   :  { %v1307_v22 = vpack.c.bf16 %v1375_v20, %v1377_v21  ;;  %v447_v10 = vpop.permute.xlu1 %446 }
  0xfd   :  { %v1379_v23 = vpop.eup %1378  ;;  %1308 = vmatprep.subr.bf16.mxu1 %v1307_v22 }
  0xfe   :  { %v1381_v24 = vpop.eup %1380  ;;  %1310 = vmatpush3.bf16.msra.mxu1 %v1307_v22 }
  0xff   :  { %v1311_v25 = vpack.c.bf16 %v1379_v23, %v1381_v24  ;;  %v457_v24 = vpop.permute.xlu1 %456 }
 0x101   :  { %v1383_v26 = vpop.eup %1382  ;;  %1312 = vmatprep.subr.bf16.mxu1 %v1311_v25 }
 0x102   :  { %v1385_v27 = vpop.eup %1384  ;;  %1314 = vmatpush3.bf16.msra.mxu1 %v1311_v25 }
 0x103   :  { %v1315_v28 = vpack.c.bf16 %v1383_v26, %v1385_v27  ;;  %v452_v26 = vpop.permute.xlu0 %451 }
 0x105   :  { %1316 = vmatprep.subr.bf16.mxu1 %v1315_v28 }
 0x106   :  { %1318 = vmatpush3.bf16.msra.mxu1 %v1315_v28 }
 0x109   :  { %1208 = vmatmul.mubr.f32.vlgmr.msra.gmra.mrb[0].mxu1 %v358_v29 }
 0x10a   :  { %1210 = vmatprep.mubr.f32.mxu1 %v359_v30 }
 0x10d   :  { %1211 = vmatmul.mubr.f32.gmra.mrb[2].mxu1 %v360_v31 }
 0x10e   :  { %1213 = vmatprep.mubr.f32.mxu1 %v361_v32 }
 0x111   :  { %1214 = vmatmul.mubr.f32.gmra.mrb[4].mxu1 %v362_v33 }
 0x112   :  { %1216 = vmatprep.mubr.f32.mxu1 %v363_v34 }
 0x115   :  { %1217 = vmatmul.mubr.f32.gmra.mrb[6].mxu1 %v364_v35  ;;  %v467_v35 = vpop.permute.xlu1 %466 }
 0x116   :  { %1219 = vmatprep.mubr.f32.mxu1 %v365_v36 }
 0x119   :  { %1220 = vmatmul.mubr.f32.gmra.mrb[8].mxu1 %v366_v37 }
 0x11a   :  { %1222 = vmatprep.mubr.f32.mxu1 %v367_v38  ;;  %v462_v38 = vpop.permute.xlu0 %461 }
 0x11d   :  { %1223 = vmatmul.mubr.f32.gmra.mrb[10].mxu1 %v368_v39 }
 0x11e   :  { %1225 = vmatprep.mubr.f32.mxu1 %v369_v40 }
 0x121   :  { %1226 = vmatmul.mubr.f32.gmra.mrb[12].mxu1 %v370_v41 }
 0x122   :  { %1228 = vmatprep.mubr.f32.mxu1 %v371_v42 }
 0x125   :  { %1229 = vmatmul.mubr.f32.gmra.mrb[14].mxu1 %v372_v43 }
 0x1dc   :  { %v1209_v51 = vpop.f32.mrb[0].mxu1 }
 0x1dd   :  { %v541_v52 = vadd.f32 %v1209_v51, %v397_v45  ;;  %v535_v53 = vpop.f32.mrb[1].mxu1 }
 0x1de   :  { %v536_v54 = vadd.f32 %v535_v53, %v392_v46  ;;  %v631_v53 = vld [vmem:[%s1870_s5 + $0x8] sm:$0xff] }
 0x1df   :  { %1386 = vtanh.f32 %v541_v52 }
 0x1e0   :  { %1388 = vtanh.f32 %v536_v54  ;;  %v1212_v56 = vpop.f32.mrb[2].mxu1  ;;  %v632_v54 = vld [vmem:[%s1870_s5 + $0x10] sm:$0xff] }
 0x1e1   :  { %v551_v58 = vadd.f32 %v1212_v56, %v407_v47  ;;  %v545_v59 = vpop.f32.mrb[3].mxu1  ;;  %v634_v56 = vld [vmem:[%s1870_s5 + $0x20] sm:$0xff] }
 0x1e2   :  { %v546_v60 = vadd.f32 %v545_v59, %v402_v48  ;;  %v637_v59 = vld [vmem:[%s1870_s5 + $0x38] sm:$0xff] }
 0x1e3   :  { %1390 = vtanh.f32 %v551_v58  ;;  %v636_v58 = vld [vmem:[%s1870_s5 + $0x30] sm:$0xff] }
 0x1e4   :  { %1392 = vtanh.f32 %v546_v60  ;;  %v1215_v61 = vpop.f32.mrb[4].mxu1  ;;  %v638_v60 = vld [vmem:[%s1870_s5 + $0x40] sm:$0xff] }
 0x1e5   :  { %v561_v62 = vadd.f32 %v1215_v61, %v417_v49  ;;  %v555_v63 = vpop.f32.mrb[5].mxu1  ;;  %v639_v61 = vld [vmem:[%s1870_s5 + $0x48] sm:$0xff] }
 0x1e6   :  { %v556_v1 = vadd.f32 %v555_v63, %v412_v50  ;;  %v641_v63 = vld [vmem:[%s1870_s5 + $0x58] sm:$0xff] }
 0x1e7   :  { %1394 = vtanh.f32 %v561_v62  ;;  %v640_v62 = vld [vmem:[%s1870_s5 + $0x50] sm:$0xff] }
 0x1e8   :  { %1396 = vtanh.f32 %v556_v1  ;;  %v1218_v3 = vpop.f32.mrb[6].mxu1  ;;  %v643_v1 = vld [vmem:[%s1870_s5 + $0x68] sm:$0xff] }
 0x1e9   :  { %v1387_v4 = vpop.eup %1386  ;;  %v571_v5 = vadd.f32 %v1218_v3, %v427_v55  ;;  %v565_v6 = vpop.f32.mrb[7].mxu1  ;;  %v633_v55 = vld [vmem:[%s1870_s5 + $0x18] sm:$0xff] }
 0x1ea   :  { %v1389_v7 = vpop.eup %1388  ;;  %v566_v8 = vadd.f32 %v565_v6, %v422_v57  ;;  %v635_v57 = vld [vmem:[%s1870_s5 + $0x28] sm:$0xff]  ;;  %v645_v3 = vld [vmem:[%s1870_s5 + $0x78] sm:$0xff] }
 0x1eb   :  { %1398 = vtanh.f32 %v571_v5  ;;  %v1319_v9 = vpack.c.bf16 %v1387_v4, %v1389_v7  ;;  %v665_v4 = vpop.permute.xlu0 %664  ;;  %v670_v5 = vpop.permute.xlu1 %669 }
 0x1ec   :  { %1400 = vtanh.f32 %v566_v8  ;;  %v1221_v11 = vpop.f32.mrb[8].mxu1 }
 0x1ed   :  { %v1391_v12 = vpop.eup %1390  ;;  %v581_v14 = vadd.f32 %v1221_v11, %v437_v0  ;;  %v575_v15 = vpop.f32.mrb[9].mxu1  ;;  %1320 = vmatprep.subr.bf16.mxu0 %v1319_v9  ;;  %v642_v0 = vld [vmem:[%s1870_s5 + $0x60] sm:$0xff] }
 0x1ee   :  { %v1393_v16 = vpop.eup %1392  ;;  %v576_v17 = vadd.f32 %v575_v15, %v432_v2  ;;  %1322 = vmatpush3.bf16.msra.mxu0 %v1319_v9  ;;  %v644_v2 = vld [vmem:[%s1870_s5 + $0x70] sm:$0xff] }
 0x1ef   :  { %1402 = vtanh.f32 %v581_v14  ;;  %v1323_v18 = vpack.c.bf16 %v1391_v12, %v1393_v16  ;;  %v675_v6 = vpop.permute.xlu0 %674  ;;  %v680_v7 = vpop.permute.xlu1 %679 }
 0x1f0   :  { %1404 = vtanh.f32 %v576_v17  ;;  %v1224_v19 = vpop.f32.mrb[10].mxu1 }
 0x1f1   :  { %v1395_v20 = vpop.eup %1394  ;;  %v591_v21 = vadd.f32 %v1224_v19, %v447_v10  ;;  %v585_v22 = vpop.f32.mrb[11].mxu1  ;;  %1324 = vmatprep.subr.bf16.mxu0 %v1323_v18 }
 0x1f2   :  { %v1397_v23 = vpop.eup %1396  ;;  %v586_v25 = vadd.f32 %v585_v22, %v442_v13  ;;  %1326 = vmatpush3.bf16.msra.mxu0 %v1323_v18 }
 0x1f3   :  { %1406 = vtanh.f32 %v591_v21  ;;  %v1327_v27 = vpack.c.bf16 %v1395_v20, %v1397_v23  ;;  %v685_v8 = vpop.permute.xlu0 %684  ;;  %v690_v9 = vpop.permute.xlu1 %689 }
 0x1f4   :  { %1408 = vtanh.f32 %v586_v25  ;;  %v1227_v28 = vpop.f32.mrb[12].mxu1 }
 0x1f5   :  { %v1399_v29 = vpop.eup %1398  ;;  %v601_v30 = vadd.f32 %v1227_v28, %v457_v24  ;;  %v595_v31 = vpop.f32.mrb[13].mxu1  ;;  %1328 = vmatprep.subr.bf16.mxu0 %v1327_v27 }
 0x1f6   :  { %v1401_v32 = vpop.eup %1400  ;;  %v596_v33 = vadd.f32 %v595_v31, %v452_v26  ;;  %1330 = vmatpush3.bf16.msra.mxu0 %v1327_v27 }
 0x1f7   :  { %1410 = vtanh.f32 %v601_v30  ;;  %v1331_v34 = vpack.c.bf16 %v1399_v29, %v1401_v32  ;;  %v695_v10 = vpop.permute.xlu0 %694  ;;  %v700_v11 = vpop.permute.xlu1 %699 }
 0x1f8   :  { %1412 = vtanh.f32 %v596_v33  ;;  %v1230_v36 = vpop.f32.mrb[14].mxu1 }
 0x1f9   :  { %v1403_v37 = vpop.eup %1402  ;;  %v611_v39 = vadd.f32 %v1230_v36, %v467_v35  ;;  %v605_v40 = vpop.f32.mrb[15].mxu1  ;;  %1332 = vmatprep.subr.bf16.mxu0 %v1331_v34 }
 0x1fa   :  { %v1405_v41 = vpop.eup %1404  ;;  %v606_v42 = vadd.f32 %v605_v40, %v462_v38  ;;  %1334 = vmatpush3.bf16.msra.mxu0 %v1331_v34 }
 0x1fb   :  { %1414 = vtanh.f32 %v611_v39  ;;  %v1335_v43 = vpack.c.bf16 %v1403_v37, %v1405_v41  ;;  %v922_v12 = vpop.permute.xlu0 %921  ;;  %v927_v13 = vpop.permute.xlu1 %926 }
 0x1fc   :  { %1416 = vtanh.f32 %v606_v42 }
 0x1fd   :  { %v1407_v44 = vpop.eup %1406  ;;  %1336 = vmatprep.subr.bf16.mxu0 %v1335_v43 }
 0x1fe   :  { %v1409_v45 = vpop.eup %1408  ;;  %1338 = vmatpush3.bf16.msra.mxu0 %v1335_v43 }
 0x1ff   :  { %v1339_v46 = vpack.c.bf16 %v1407_v44, %v1409_v45  ;;  %v705_v14 = vpop.permute.xlu0 %704  ;;  %v932_v15 = vpop.permute.xlu1 %931 }
 0x201   :  { %v1411_v47 = vpop.eup %1410  ;;  %1340 = vmatprep.subr.bf16.mxu0 %v1339_v46 }
 0x202   :  { %v1413_v48 = vpop.eup %1412  ;;  %1342 = vmatpush3.bf16.msra.mxu0 %v1339_v46 }
 0x203   :  { %v1343_v49 = vpack.c.bf16 %v1411_v47, %v1413_v48  ;;  %v710_v16 = vpop.permute.xlu0 %709  ;;  %v937_v17 = vpop.permute.xlu1 %936 }
 0x205   :  { %v1415_v50 = vpop.eup %1414  ;;  %1344 = vmatprep.subr.bf16.mxu0 %v1343_v49 }
 0x206   :  { %v1417_v51 = vpop.eup %1416  ;;  %1346 = vmatpush3.bf16.msra.mxu0 %v1343_v49 }
 0x207   :  { %v1347_v52 = vpack.c.bf16 %v1415_v50, %v1417_v51  ;;  %v715_v18 = vpop.permute.xlu0 %714  ;;  %v942_v19 = vpop.permute.xlu1 %941 }
 0x209   :  { %1348 = vmatprep.subr.bf16.mxu0 %v1347_v52 }
 0x20a   :  { %1350 = vmatpush3.bf16.msra.mxu0 %v1347_v52 }
 0x20b   :  { %v720_v20 = vpop.permute.xlu0 %719  ;;  %v947_v24 = vpop.permute.xlu1 %946 }
 0x20d   :  { %1264 = vmatmul.mubr.f32.vlgmr.msra.gmra.mrb[16].mxu0 %v631_v53 }
 0x20e   :  { %1266 = vmatprep.mubr.f32.mxu0 %v632_v54 }
 0x20f   :  { %v725_v29 = vpop.permute.xlu0 %724  ;;  %v952_v31 = vpop.permute.xlu1 %951 }
 0x211   :  { %1267 = vmatmul.mubr.f32.gmra.mrb[18].mxu0 %v633_v55 }
 0x212   :  { %1269 = vmatprep.mubr.f32.mxu0 %v634_v56 }
 0x213   :  { %v730_v36 = vpop.permute.xlu0 %729  ;;  %v957_v42 = vpop.permute.xlu1 %956 }
 0x215   :  { %1270 = vmatmul.mubr.f32.gmra.mrb[20].mxu0 %v635_v57 }
 0x216   :  { %1272 = vmatprep.mubr.f32.mxu0 %v636_v58 }
 0x217   :  { %v735_v52 = vpop.permute.xlu0 %734  ;;  %v962_v55 = vpop.permute.xlu1 %961 }
 0x219   :  { %1273 = vmatmul.mubr.f32.gmra.mrb[22].mxu0 %v637_v59 }
 0x21a   :  { %1275 = vmatprep.mubr.f32.mxu0 %v638_v60 }
 0x21d   :  { %1276 = vmatmul.mubr.f32.gmra.mrb[24].mxu0 %v639_v61 }
 0x21e   :  { %1278 = vmatprep.mubr.f32.mxu0 %v640_v62 }
 0x221   :  { %1279 = vmatmul.mubr.f32.gmra.mrb[26].mxu0 %v641_v63 }
 0x222   :  { %1281 = vmatprep.mubr.f32.mxu0 %v642_v0 }
 0x225   :  { %1282 = vmatmul.mubr.f32.gmra.mrb[28].mxu0 %v643_v1 }
 0x226   :  { %1284 = vmatprep.mubr.f32.mxu0 %v644_v2  ;;  %v740_v2 = vpop.permute.xlu0 %739 }
 0x229   :  { %1285 = vmatmul.mubr.f32.gmra.mrb[30].mxu0 %v645_v3 }
 0x2e0   :  { %v1265_v21 = vpop.f32.mrb[16].mxu0 }
 0x2e1   :  { %v814_v22 = vadd.f32 %v1265_v21, %v670_v5  ;;  %v808_v23 = vpop.f32.mrb[17].mxu0  ;;  %v972_v21 = vpop.permute.xlu0 %971 }
 0x2e2   :  { %v809_v25 = vadd.f32 %v808_v23, %v665_v4 }
 0x2e3   :  { %1418 = vtanh.f32 %v814_v22 }
 0x2e4   :  { %1420 = vtanh.f32 %v809_v25  ;;  %v1268_v26 = vpop.f32.mrb[18].mxu0 }
 0x2e5   :  { %v824_v27 = vadd.f32 %v1268_v26, %v680_v7  ;;  %v818_v28 = vpop.f32.mrb[19].mxu0 }
 0x2e6   :  { %v819_v30 = vadd.f32 %v818_v28, %v675_v6 }
 0x2e7   :  { %1422 = vtanh.f32 %v824_v27 }
 0x2e8   :  { %1424 = vtanh.f32 %v819_v30  ;;  %v1271_v32 = vpop.f32.mrb[20].mxu0 }
 0x2e9   :  { %v834_v33 = vadd.f32 %v1271_v32, %v690_v9  ;;  %v828_v34 = vpop.f32.mrb[21].mxu0  ;;  %v982_v32 = vpop.permute.xlu0 %981 }
 0x2ea   :  { %v829_v35 = vadd.f32 %v828_v34, %v685_v8 }
 0x2eb   :  { %1426 = vtanh.f32 %v834_v33 }
 0x2ec   :  { %1428 = vtanh.f32 %v829_v35  ;;  %v1274_v37 = vpop.f32.mrb[22].mxu0 }
 0x2ed   :  { %v1419_v38 = vpop.eup %1418  ;;  %v844_v39 = vadd.f32 %v1274_v37, %v700_v11  ;;  %v838_v40 = vpop.f32.mrb[23].mxu0 }
 0x2ee   :  { %v1421_v41 = vpop.eup %1420  ;;  %v1000_v43 = vmul.f32 %v1419_v38, %v927_v13  ;;  %v839_v44 = vadd.f32 %v838_v40, %v695_v10  ;;  %v967_v10 = vpop.permute.xlu1 %966 }
 0x2ef   :  { %v999_v45 = vmul.f32 %v1421_v41, %v922_v12  ;;  %1430 = vtanh.f32 %v844_v39 }
 0x2f0   :  { %1432 = vtanh.f32 %v839_v44  ;;  %v1277_v46 = vpop.f32.mrb[24].mxu0  ;;  %v992_v44 = vpop.permute.xlu0 %991 }
 0x2f1   :  { %v1423_v47 = vpop.eup %1422  ;;  %v1015_v48 = vadd.f32 %v1000_v43, %v999_v45  ;;  %v854_v49 = vadd.f32 %v1277_v46, %v710_v16  ;;  %v848_v50 = vpop.f32.mrb[25].mxu0 }
 0x2f2   :  { %v1425_v51 = vpop.eup %1424  ;;  %v849_v53 = vadd.f32 %v848_v50, %v705_v14  ;;  %v1002_v58 = vmul.f32 %v1423_v47, %v937_v17  ;;  %v977_v25 = vpop.permute.xlu1 %976  ;;  %v1042_v50 = vlaneseq }
 0x2f3   :  { %v1001_v54 = vmul.f32 %v1425_v51, %v932_v15  ;;  %1434 = vtanh.f32 %v854_v49 }
 0x2f4   :  { %1436 = vtanh.f32 %v849_v53  ;;  %v1280_v56 = vpop.f32.mrb[26].mxu0  ;;  %v1043_v53 = vshrl.u32 %v1042_v50, 7 }
 0x2f5   :  { %v1427_v57 = vpop.eup %1426  ;;  %v1016_v59 = vadd.f32 %v1015_v48, %v1001_v54  ;;  %v864_v60 = vadd.f32 %v1280_v56, %v720_v20  ;;  %v858_v61 = vpop.f32.mrb[27].mxu0 }
 0x2f6   :  { %v1429_v62 = vpop.eup %1428  ;;  %v859_v63 = vadd.f32 %v858_v61, %v715_v18  ;;  %v1004_v5 = vmul.f32 %v1427_v57, %v947_v24  ;;  %v987_v37 = vpop.permute.xlu1 %986  ;;  %v1044_v56 = vsub.s32 0, %v1043_v53 }
 0x2f7   :  { %v1003_v0 = vmul.f32 %v1429_v62, %v942_v19  ;;  %v1017_v1 = vadd.f32 %v1016_v59, %v1002_v58  ;;  %1438 = vtanh.f32 %v864_v60  ;;  %v1040_v58 = vpop.permute.xlu0 %1039 }
 0x2f8   :  { %1440 = vtanh.f32 %v859_v63  ;;  %v1283_v3 = vpop.f32.mrb[28].mxu0  ;;  %v1045_v60 = vrot.slane %v1040_v58, %v1044_v56 }
 0x2f9   :  { %v1431_v4 = vpop.eup %1430  ;;  %v1018_v6 = vadd.f32 %v1017_v1, %v1003_v0  ;;  %v874_v7 = vadd.f32 %v1283_v3, %v730_v36  ;;  %v868_v8 = vpop.f32.mrb[29].mxu0 }
 0x2fa   :  { %v1433_v9 = vpop.eup %1432  ;;  %v869_v11 = vadd.f32 %v868_v8, %v725_v29  ;;  %v1006_v16 = vmul.f32 %v1431_v4, %v957_v42  ;;  %v997_v47 = vpop.permute.xlu1 %996 }
 0x2fb   :  { %v1005_v12 = vmul.f32 %v1433_v9, %v952_v31  ;;  %v1019_v13 = vadd.f32 %v1018_v6, %v1004_v5  ;;  %1442 = vtanh.f32 %v874_v7 }
 0x2fc   :  { %1444 = vtanh.f32 %v869_v11  ;;  %v1286_v14 = vpop.f32.mrb[30].mxu0 }
 0x2fd   :  { %v1435_v15 = vpop.eup %1434  ;;  %v1020_v17 = vadd.f32 %v1019_v13, %v1005_v12  ;;  %v884_v18 = vadd.f32 %v1286_v14, %v740_v2  ;;  %v878_v19 = vpop.f32.mrb[31].mxu0 }
 0x2fe   :  { %v1437_v20 = vpop.eup %1436  ;;  %v879_v22 = vadd.f32 %v878_v19, %v735_v52  ;;  %v1008_v27 = vmul.f32 %v1435_v15, %v967_v10 }
 0x2ff   :  { %v1007_v23 = vmul.f32 %v1437_v20, %v962_v55  ;;  %v1021_v24 = vadd.f32 %v1020_v17, %v1006_v16  ;;  %1446 = vtanh.f32 %v884_v18 }
 0x300   :  { %1448 = vtanh.f32 %v879_v22 }
 0x301   :  { %v1439_v26 = vpop.eup %1438  ;;  %v1022_v28 = vadd.f32 %v1021_v24, %v1007_v23 }
 0x302   :  { %v1441_v29 = vpop.eup %1440  ;;  %v1010_v34 = vmul.f32 %v1439_v26, %v977_v25 }
 0x303   :  { %v1009_v30 = vmul.f32 %v1441_v29, %v972_v21  ;;  %v1023_v31 = vadd.f32 %v1022_v28, %v1008_v27 }
 0x305   :  { %v1443_v33 = vpop.eup %1442  ;;  %v1024_v35 = vadd.f32 %v1023_v31, %v1009_v30 }
 0x306   :  { %v1445_v36 = vpop.eup %1444  ;;  %v1012_v41 = vmul.f32 %v1443_v33, %v987_v37 }
 0x307   :  { %v1011_v38 = vmul.f32 %v1445_v36, %v982_v32  ;;  %v1025_v39 = vadd.f32 %v1024_v35, %v1010_v34 }
 0x309   :  { %v1447_v40 = vpop.eup %1446  ;;  %v1026_v42 = vadd.f32 %v1025_v39, %v1011_v38 }
 0x30a   :  { %v1449_v43 = vpop.eup %1448  ;;  %v1014_v48 = vmul.f32 %v1447_v40, %v997_v47 }
 0x30b   :  { %v1013_v45 = vmul.f32 %v1449_v43, %v992_v44  ;;  %v1027_v46 = vadd.f32 %v1026_v42, %v1012_v41 }
 0x30d   :  { %v1028_v49 = vadd.f32 %v1027_v46, %v1013_v45 }
 0x30f   :  { %v1029_v51 = vadd.f32 %v1028_v49, %v1014_v48 }
 0x311   :  { %v1030_v52 = vrot.slane %v1029_v51, 4 }
 0x313   :  { %v1031_v54 = vadd.f32 %v1030_v52, %v1029_v51 }
 0x315   :  { %v1032_v55 = vrot.slane %v1031_v54, 2 }
 0x317   :  { %v1033_v57 = vadd.f32 %v1032_v55, %v1031_v54 }
 0x319   :  { %v1034_v59 = vrot.slane %v1033_v57, 1 }
 0x31b   :  { %v1035_v61 = vadd.f32 %v1034_v59, %v1033_v57 }
 0x31d   :  { %v1046_v62 = vadd.f32 %v1045_v60, %v1035_v61 }
 0x31f   :  { %1047 = vst [vmem:[%s1871_s9] sm:$0x1] %v1046_v62 }

</bundles_post_ra>
